<compile_context>
chip_gen: v5e
topology: v5e:2x2
jax: 0.10.0
libtpu: 0.0.40
codegen_flags: <defaults>
</compile_context>

<pallas_src>
import functools

import jax
import jax.numpy as jnp
from jax.experimental import pallas as pl
from jax.experimental.pallas import tpu as pltpu


# ----------------------------------------------------------------------------
# Kernels
# ----------------------------------------------------------------------------
def _norm_mix(res_f32, w_ref, b_ref, out_ref, *, eps, inv_d):
    """LayerNorm(res_f32) with affine folded into (w_ref, b_ref), then matmul."""
    # One-pass mean / variance: var = E[x^2] - mean^2 (single reduction sweep).
    s1 = jnp.sum(res_f32, axis=-1, keepdims=True)
    s2 = jnp.sum(res_f32 * res_f32, axis=-1, keepdims=True)
    mean = s1 * inv_d
    var = jnp.maximum(s2 * inv_d - mean * mean, 0.0)
    x = (res_f32 - mean) * jax.lax.rsqrt(var + eps)

    # MXU: both operands in the (possibly bf16) folded-weight dtype; fp32 accumulate.
    x = x.astype(w_ref.dtype)
    y = jnp.dot(x, w_ref[...], preferred_element_type=jnp.float32)
    out_ref[...] = (y + b_ref[...]).astype(out_ref.dtype)


def _fused_block_kernel(hs_ref, res_ref, w_ref, b_ref, out_ref, res_out_ref,
                        *, eps, inv_d):
    # hs_ref / res_ref: (TM, D); w_ref: (D, D); b_ref: (1, D) fp32.
    res = res_ref[...].astype(jnp.float32) + hs_ref[...].astype(jnp.float32)
    res_out_ref[...] = res.astype(res_out_ref.dtype)
    _norm_mix(res, w_ref, b_ref, out_ref, eps=eps, inv_d=inv_d)


def _fused_block_first_kernel(hs_ref, w_ref, b_ref, out_ref, res_out_ref,
                              *, eps, inv_d):
    # First block: residual = hidden_states (no zero tensor materialized).
    res = hs_ref[...].astype(jnp.float32)
    res_out_ref[...] = res.astype(res_out_ref.dtype)
    _norm_mix(res, w_ref, b_ref, out_ref, eps=eps, inv_d=inv_d)


# ----------------------------------------------------------------------------
# Wrapper helpers
# ----------------------------------------------------------------------------
def _vmem_capacity_bytes():
    """Physical per-core VMEM; conservative (v7x = 64 MiB) if the query fails."""
    try:
        info = pltpu.get_tpu_info()
        cap = getattr(info, "vmem_capacity_bytes", None)
        if cap:
            return int(cap)
    except Exception:
        pass
    return 64 * 1024 * 1024


def _pick_row_tile(M, per_row_bytes, row_budget_bytes):
    """Largest MXU-friendly (256-biased) row tile fitting the VMEM row budget,
    preferring >= 2 grid steps so double-buffering and v7x megacore stay active."""
    max_rows = max(8, row_budget_bytes // max(per_row_bytes, 1))
    for tm in (2048, 1024, 512, 256, 128, 64, 32, 16, 8):
        if tm <= max_rows and M > tm:
            return tm
    return 8


def _const_spec(shape, single_buffer):
    """BlockSpec for a block whose index never changes; single-buffered if possible."""
    if single_buffer:
        try:
            return pl.BlockSpec(shape, lambda i: (0, 0),
                                pipeline_mode=pl.Buffered(1))
        except Exception:
            pass
    return pl.BlockSpec(shape, lambda i: (0, 0))


# ----------------------------------------------------------------------------
# Public wrapper (JAX/Pallas equivalent of Block.forward)
# ----------------------------------------------------------------------------
def block_forward(hidden_states, residual, norm_weight, norm_bias,
                  mix_weight, mix_bias, *, eps=1e-5, residual_in_fp32=True):
    """Add -> LayerNorm -> Mixer, returning (mixer_output, residual).

    mix_weight is (D_in, D_out)."""
    B, L, D = hidden_states.shape
    M = B * L
    hs2 = hidden_states.reshape(M, D)

    act_dtype = hidden_states.dtype
    out_dtype = act_dtype                                 # output follows activations
    res_dtype = jnp.float32 if residual_in_fp32 else act_dtype

    # --- Fold LayerNorm affine into the mixer (wrapper side, fp32 math) ------
    f32 = jnp.float32
    mm_dtype = (jnp.bfloat16
                if (act_dtype == jnp.bfloat16 or mix_weight.dtype == jnp.bfloat16)
                else jnp.float32)
    w_fold = (norm_weight.astype(f32)[:, None]
              * mix_weight.astype(f32)).astype(mm_dtype)              # (D, D)
    b_fold = (norm_bias.astype(f32) @ mix_weight.astype(f32)
              + mix_bias.astype(f32)).reshape(1, D)                   # (1, D) fp32

    # --- VMEM accounting (generation-aware) ----------------------------------
    act_isz = jnp.dtype(act_dtype).itemsize
    out_isz = jnp.dtype(out_dtype).itemsize
    res_isz = jnp.dtype(res_dtype).itemsize
    w_isz = jnp.dtype(mm_dtype).itemsize
    res_in_isz = 0 if residual is None else jnp.dtype(residual.dtype).itemsize

    vmem_cap = _vmem_capacity_bytes()
    vmem_cap_use = int(vmem_cap * 0.70)            # ~44 MiB on v7x, ~89 MiB v5e/v6e
    fixed_bytes = D * D * w_isz + D * 4 + 4096     # resident weight + bias + slack
    # Double-buffered row streams + ~4 fp32 intermediates per element.
    per_row = (2 * (act_isz + res_in_isz + out_isz + res_isz) + 4 * 4) * D

    TM = _pick_row_tile(M, per_row, max(vmem_cap_use - fixed_bytes, 1 << 20))
    grid = (pl.cdiv(M, TM),)                       # ragged last tile is fine (LN is per-row)

    need = TM * per_row + fixed_bytes
    vmem_limit = int(min(vmem_cap_use, max(32 * 1024 * 1024, int(need * 1.25))))

    # --- Cost estimate (per-stream byte accounting; weight counted once) -----
    bytes_accessed = (M * D * (act_isz + out_isz + res_isz)
                      + (M * D * res_in_isz if residual is not None else 0)
                      + D * D * w_isz + D * 4)
    cost = pl.CostEstimate(
        flops=2 * M * D * D + 8 * M * D,
        transcendentals=M,                         # one rsqrt per row
        bytes_accessed=int(bytes_accessed),
    )

    compiler_params = pltpu.CompilerParams(
        dimension_semantics=("parallel",),
        vmem_limit_bytes=vmem_limit,
    )

    row_spec = pl.BlockSpec((TM, D), lambda i: (i, 0))
    inv_d = 1.0 / D

    def _run(single_buffer_consts):
        w_spec = _const_spec((D, D), single_buffer_consts)
        b_spec = _const_spec((1, D), single_buffer_consts)
        if residual is None:
            kernel = functools.partial(_fused_block_first_kernel,
                                       eps=eps, inv_d=inv_d)
            in_specs = [row_spec, w_spec, b_spec]
            args = (hs2, w_fold, b_fold)
        else:
            kernel = functools.partial(_fused_block_kernel,
                                       eps=eps, inv_d=inv_d)
            in_specs = [row_spec, row_spec, w_spec, b_spec]
            args = (hs2, residual.reshape(M, D), w_fold, b_fold)
        return pl.pallas_call(
            kernel,
            out_shape=(jax.ShapeDtypeStruct((M, D), out_dtype),
                       jax.ShapeDtypeStruct((M, D), res_dtype)),
            grid=grid,
            in_specs=in_specs,
            out_specs=(row_spec, row_spec),
            compiler_params=compiler_params,
            cost_estimate=cost,
        )(*args)

    try:
        mixed, new_residual = _run(True)
    except Exception:
        # pipeline_mode=Buffered(1) not supported on this jax version:
        # fall back to default (double-buffered) pipelining for the constants.
        mixed, new_residual = _run(False)

    return mixed.reshape(B, L, D), new_residual.reshape(B, L, D)


# ----------------------------------------------------------------------------
# Pure-JAX reference + test
# ----------------------------------------------------------------------------
def _reference_forward(hidden_states, residual, norm_w, norm_b, mix_w, mix_b,
                       eps=1e-5):
    if residual is None:
        res = hidden_states.astype(jnp.float32)
    else:
        res = residual.astype(jnp.float32) + hidden_states.astype(jnp.float32)
    mean = jnp.mean(res, axis=-1, keepdims=True)
    var = jnp.mean((res - mean) ** 2, axis=-1, keepdims=True)
    normed = (res - mean) * jax.lax.rsqrt(var + eps) * norm_w + norm_b
    mixed = normed @ mix_w + mix_b
    return mixed, res


if __name__ == "__main__":
    key = jax.random.PRNGKey(0)
    k_hs, k_res, k_nw, k_nb, k_mw, k_mb = jax.random.split(key, 6)

    B, L, D = 2, 8, 32
    hidden_states = jax.random.normal(k_hs, (B, L, D), dtype=jnp.float32)
    residual = jax.random.normal(k_res, (B, L, D), dtype=jnp.float32)

    norm_weight = jnp.ones((D,), dtype=jnp.float32) \
        + 0.01 * jax.random.normal(k_nw, (D,), dtype=jnp.float32)
    norm_bias = 0.01 * jax.random.normal(k_nb, (D,), dtype=jnp.float32)
    mix_weight = jax.random.normal(k_mw, (D, D), dtype=jnp.float32) / jnp.sqrt(D)
    mix_bias = 0.01 * jax.random.normal(k_mb, (D,), dtype=jnp.float32)

    # --- Standard path (residual provided) ----------------------------------
    out_hs, out_res = block_forward(
        hidden_states, residual, norm_weight, norm_bias, mix_weight, mix_bias)
    out_hs = jax.block_until_ready(out_hs)
    out_res = jax.block_until_ready(out_res)

    ref_hs, ref_res = _reference_forward(
        hidden_states, residual, norm_weight, norm_bias, mix_weight, mix_bias)

    assert out_hs.shape == (B, L, D) and out_res.shape == (B, L, D)
    assert jnp.allclose(out_hs, ref_hs, atol=1e-4, rtol=1e-4)
    assert jnp.allclose(out_res, ref_res, atol=1e-5, rtol=1e-5)

    # --- First-block path (residual=None) -----------------------------------
    out_hs0, out_res0 = block_forward(
        hidden_states, None, norm_weight, norm_bias, mix_weight, mix_bias)
    out_hs0 = jax.block_until_ready(out_hs0)
    out_res0 = jax.block_until_ready(out_res0)
    ref_hs0, ref_res0 = _reference_forward(
        hidden_states, None, norm_weight, norm_bias, mix_weight, mix_bias)
    assert jnp.allclose(out_hs0, ref_hs0, atol=1e-4, rtol=1e-4)
    assert jnp.allclose(out_res0, ref_res0, atol=1e-5, rtol=1e-5)

    # --- Ragged-grid path: M not divisible by the row tile (Vim-style L) -----
    L2 = 7  # M = 14 -> TM = 8, grid = 2 with a ragged last block
    hs2 = jax.random.normal(k_hs, (B, L2, D), dtype=jnp.float32)
    res2 = jax.random.normal(k_res, (B, L2, D), dtype=jnp.float32)
    out_hs2, out_res2 = block_forward(
        hs2, res2, norm_weight, norm_bias, mix_weight, mix_bias)
    out_hs2 = jax.block_until_ready(out_hs2)
    out_res2 = jax.block_until_ready(out_res2)
    ref_hs2, ref_res2 = _reference_forward(
        hs2, res2, norm_weight, norm_bias, mix_weight, mix_bias)
    assert jnp.allclose(out_hs2, ref_hs2, atol=1e-4, rtol=1e-4)
    assert jnp.allclose(out_res2, ref_res2, atol=1e-5, rtol=1e-5)

    print("KERNEL_OK")
</pallas_src>

<mosaic_0001>
module attributes {stable_mosaic.version = 11 : i64} {
  func.func @_fused_block_kernel(%arg0: i32, %arg1: memref<8x32xf32, #tpu.memory_space<vmem>>, %arg2: memref<8x32xf32, #tpu.memory_space<vmem>>, %arg3: memref<32x32xf32, #tpu.memory_space<vmem>>, %arg4: memref<1x32xf32, #tpu.memory_space<vmem>>, %arg5: memref<8x32xf32, #tpu.memory_space<vmem>>, %arg6: memref<8x32xf32, #tpu.memory_space<vmem>>) attributes {dimension_semantics = [#tpu.dimension_semantics<parallel>], iteration_bounds = array<i64: 2>, scalar_prefetch = 0 : i64, scratch_operands = 0 : i64, tpu.core_type = #tpu.core_type<tc>, window_params = [{transform_indices = @transform_0, window_bounds = array<i64: 8, 32>}, {transform_indices = @transform_1, window_bounds = array<i64: 8, 32>}, {pipeline_mode = #tpu.pipeline_mode<synchronous>, transform_indices = @transform_2, window_bounds = array<i64: 32, 32>}, {pipeline_mode = #tpu.pipeline_mode<synchronous>, transform_indices = @transform_3, window_bounds = array<i64: 1, 32>}, {transform_indices = @transform_4, window_bounds = array<i64: 8, 32>}, {transform_indices = @transform_5, window_bounds = array<i64: 8, 32>}]} {
    %c0 = arith.constant 0 : index
    %c0_0 = arith.constant 0 : index
    %0 = vector.load %arg2[%c0, %c0_0] : memref<8x32xf32, #tpu.memory_space<vmem>>, vector<8x32xf32>
    %c0_1 = arith.constant 0 : index
    %c0_2 = arith.constant 0 : index
    %1 = vector.load %arg1[%c0_1, %c0_2] : memref<8x32xf32, #tpu.memory_space<vmem>>, vector<8x32xf32>
    %2 = arith.addf %0, %1 : vector<8x32xf32>
    %c0_3 = arith.constant 0 : index
    %c0_4 = arith.constant 0 : index
    %3 = vector.load %arg6[%c0_3, %c0_4] : memref<8x32xf32, #tpu.memory_space<vmem>>, vector<8x32xf32>
    tpu.vector_store %arg6[%c0_3, %c0_4], %2 {strides = array<i32>} : memref<8x32xf32, #tpu.memory_space<vmem>>, vector<8x32xf32>,
    %cst = arith.constant dense<0.000000e+00> : vector<8xf32>
    %4 = vector.multi_reduction <add>, %2, %cst [1] : vector<8x32xf32> to vector<8xf32>
    %5 = vector.shape_cast %4 : vector<8xf32> to vector<8x1xf32>
    %6 = arith.mulf %2, %2 : vector<8x32xf32>
    %cst_5 = arith.constant dense<0.000000e+00> : vector<8xf32>
    %7 = vector.multi_reduction <add>, %6, %cst_5 [1] : vector<8x32xf32> to vector<8xf32>
    %8 = vector.shape_cast %7 : vector<8xf32> to vector<8x1xf32>
    %cst_6 = arith.constant 3.125000e-02 : f32
    %9 = vector.broadcast %cst_6 : f32 to vector<8x1xf32>
    %10 = arith.mulf %5, %9 : vector<8x1xf32>
    %cst_7 = arith.constant 3.125000e-02 : f32
    %11 = vector.broadcast %cst_7 : f32 to vector<8x1xf32>
    %12 = arith.mulf %8, %11 : vector<8x1xf32>
    %13 = arith.mulf %10, %10 : vector<8x1xf32>
    %14 = arith.subf %12, %13 : vector<8x1xf32>
    %cst_8 = arith.constant 0.000000e+00 : f32
    %15 = vector.broadcast %cst_8 : f32 to vector<8x1xf32>
    %16 = arith.maximumf %14, %15 : vector<8x1xf32>
    %17 = vector.broadcast %10 : vector<8x1xf32> to vector<8x32xf32>
    %18 = arith.subf %2, %17 : vector<8x32xf32>
    %cst_9 = arith.constant 9.99999974E-6 : f32
    %19 = vector.broadcast %cst_9 : f32 to vector<8x1xf32>
    %20 = arith.addf %16, %19 : vector<8x1xf32>
    %21 = math.rsqrt %20 : vector<8x1xf32>
    %22 = vector.broadcast %21 : vector<8x1xf32> to vector<8x32xf32>
    %23 = arith.mulf %18, %22 : vector<8x32xf32>
    %c0_10 = arith.constant 0 : index
    %c0_11 = arith.constant 0 : index
    %24 = vector.load %arg3[%c0_10, %c0_11] : memref<32x32xf32, #tpu.memory_space<vmem>>, vector<32x32xf32>
    %cst_12 = arith.constant dense<0.000000e+00> : vector<8x32xf32>
    %25 = tpu.matmul %23, %24, %cst_12 {dimension_numbers = #tpu.dot_dimension_numbers<[1], [0], [0], [1], [0, 0, 1, 1], [], []>} : vector<8x32xf32>, vector<32x32xf32>, vector<8x32xf32> -> vector<8x32xf32>
    %c0_13 = arith.constant 0 : index
    %c0_14 = arith.constant 0 : index
    %26 = vector.load %arg4[%c0_13, %c0_14] : memref<1x32xf32, #tpu.memory_space<vmem>>, vector<1x32xf32>
    %27 = vector.broadcast %26 : vector<1x32xf32> to vector<8x32xf32>
    %28 = arith.addf %25, %27 : vector<8x32xf32>
    %c0_15 = arith.constant 0 : index
    %c0_16 = arith.constant 0 : index
    %29 = vector.load %arg5[%c0_15, %c0_16] : memref<8x32xf32, #tpu.memory_space<vmem>>, vector<8x32xf32>
    tpu.vector_store %arg5[%c0_15, %c0_16], %28 {strides = array<i32>} : memref<8x32xf32, #tpu.memory_space<vmem>>, vector<8x32xf32>,
    return
  }
  func.func @transform_0(%arg0: i32) -> (i32, i32) {
    %c0_i32 = arith.constant 0 : i32
    %c0_i32_0 = arith.constant 0 : i32
    return %arg0, %c0_i32 : i32, i32
  }
  func.func @transform_1(%arg0: i32) -> (i32, i32) {
    %c0_i32 = arith.constant 0 : i32
    %c0_i32_0 = arith.constant 0 : i32
    return %arg0, %c0_i32 : i32, i32
  }
  func.func @transform_2(%arg0: i32) -> (i32, i32) {
    %c0_i32 = arith.constant 0 : i32
    %c0_i32_0 = arith.constant 0 : i32
    %c0_i32_1 = arith.constant 0 : i32
    return %c0_i32, %c0_i32_0 : i32, i32
  }
  func.func @transform_3(%arg0: i32) -> (i32, i32) {
    %c0_i32 = arith.constant 0 : i32
    %c0_i32_0 = arith.constant 0 : i32
    %c0_i32_1 = arith.constant 0 : i32
    return %c0_i32, %c0_i32_0 : i32, i32
  }
  func.func @transform_4(%arg0: i32) -> (i32, i32) {
    %c0_i32 = arith.constant 0 : i32
    %c0_i32_0 = arith.constant 0 : i32
    return %arg0, %c0_i32 : i32, i32
  }
  func.func @transform_5(%arg0: i32) -> (i32, i32) {
    %c0_i32 = arith.constant 0 : i32
    %c0_i32_0 = arith.constant 0 : i32
    return %arg0, %c0_i32 : i32, i32
  }
}

module attributes {stable_mosaic.version = 11 : i64} {
  func.func @_fused_block_kernel(%arg0: i32, %arg1: memref<8x32xf32, #tpu.memory_space<vmem>>, %arg2: memref<8x32xf32, #tpu.memory_space<vmem>>, %arg3: memref<32x32xf32, #tpu.memory_space<vmem>>, %arg4: memref<1x32xf32, #tpu.memory_space<vmem>>, %arg5: memref<8x32xf32, #tpu.memory_space<vmem>>, %arg6: memref<8x32xf32, #tpu.memory_space<vmem>>) attributes {dimension_semantics = [#tpu.dimension_semantics<parallel>], iteration_bounds = array<i64: 2>, scalar_prefetch = 0 : i64, scratch_operands = 0 : i64, tpu.core_type = #tpu.core_type<tc>, window_params = [{transform_indices = @transform_0, window_bounds = array<i64: 8, 32>}, {transform_indices = @transform_1, window_bounds = array<i64: 8, 32>}, {pipeline_mode = #tpu.pipeline_mode<synchronous>, transform_indices = @transform_2, window_bounds = array<i64: 32, 32>}, {pipeline_mode = #tpu.pipeline_mode<synchronous>, transform_indices = @transform_3, window_bounds = array<i64: 1, 32>}, {transform_indices = @transform_4, window_bounds = array<i64: 8, 32>}, {transform_indices = @transform_5, window_bounds = array<i64: 8, 32>}]} {
    %c0 = arith.constant 0 : index
    %c0_0 = arith.constant 0 : index
    %0 = vector.load %arg2[%c0, %c0_0] : memref<8x32xf32, #tpu.memory_space<vmem>>, vector<8x32xf32>
    %c0_1 = arith.constant 0 : index
    %c0_2 = arith.constant 0 : index
    %1 = vector.load %arg1[%c0_1, %c0_2] : memref<8x32xf32, #tpu.memory_space<vmem>>, vector<8x32xf32>
    %2 = arith.addf %0, %1 : vector<8x32xf32>
    %c0_3 = arith.constant 0 : index
    %c0_4 = arith.constant 0 : index
    %3 = vector.load %arg6[%c0_3, %c0_4] : memref<8x32xf32, #tpu.memory_space<vmem>>, vector<8x32xf32>
    tpu.vector_store %arg6[%c0_3, %c0_4], %2 {strides = array<i32>} : memref<8x32xf32, #tpu.memory_space<vmem>>, vector<8x32xf32>,
    %cst = arith.constant dense<0.000000e+00> : vector<8xf32>
    %4 = vector.multi_reduction <add>, %2, %cst [1] : vector<8x32xf32> to vector<8xf32>
    %5 = vector.shape_cast %4 : vector<8xf32> to vector<8x1xf32>
    %6 = arith.mulf %2, %2 : vector<8x32xf32>
    %cst_5 = arith.constant dense<0.000000e+00> : vector<8xf32>
    %7 = vector.multi_reduction <add>, %6, %cst_5 [1] : vector<8x32xf32> to vector<8xf32>
    %8 = vector.shape_cast %7 : vector<8xf32> to vector<8x1xf32>
    %cst_6 = arith.constant 3.125000e-02 : f32
    %9 = vector.broadcast %cst_6 : f32 to vector<8x1xf32>
    %10 = arith.mulf %5, %9 : vector<8x1xf32>
    %cst_7 = arith.constant 3.125000e-02 : f32
    %11 = vector.broadcast %cst_7 : f32 to vector<8x1xf32>
    %12 = arith.mulf %8, %11 : vector<8x1xf32>
    %13 = arith.mulf %10, %10 : vector<8x1xf32>
    %14 = arith.subf %12, %13 : vector<8x1xf32>
    %cst_8 = arith.constant 0.000000e+00 : f32
    %15 = vector.broadcast %cst_8 : f32 to vector<8x1xf32>
    %16 = arith.maximumf %14, %15 : vector<8x1xf32>
    %17 = vector.broadcast %10 : vector<8x1xf32> to vector<8x32xf32>
    %18 = arith.subf %2, %17 : vector<8x32xf32>
    %cst_9 = arith.constant 9.99999974E-6 : f32
    %19 = vector.broadcast %cst_9 : f32 to vector<8x1xf32>
    %20 = arith.addf %16, %19 : vector<8x1xf32>
    %21 = math.rsqrt %20 : vector<8x1xf32>
    %22 = vector.broadcast %21 : vector<8x1xf32> to vector<8x32xf32>
    %23 = arith.mulf %18, %22 : vector<8x32xf32>
    %c0_10 = arith.constant 0 : index
    %c0_11 = arith.constant 0 : index
    %24 = vector.load %arg3[%c0_10, %c0_11] : memref<32x32xf32, #tpu.memory_space<vmem>>, vector<32x32xf32>
    %cst_12 = arith.constant dense<0.000000e+00> : vector<8x32xf32>
    %25 = tpu.matmul %23, %24, %cst_12 {dimension_numbers = #tpu.dot_dimension_numbers<[1], [0], [0], [1], [0, 0, 1, 1], [], []>} : vector<8x32xf32>, vector<32x32xf32>, vector<8x32xf32> -> vector<8x32xf32>
    %c0_13 = arith.constant 0 : index
    %c0_14 = arith.constant 0 : index
    %26 = vector.load %arg4[%c0_13, %c0_14] : memref<1x32xf32, #tpu.memory_space<vmem>>, vector<1x32xf32>
    %27 = vector.broadcast %26 : vector<1x32xf32> to vector<8x32xf32>
    %28 = arith.addf %25, %27 : vector<8x32xf32>
    %c0_15 = arith.constant 0 : index
    %c0_16 = arith.constant 0 : index
    %29 = vector.load %arg5[%c0_15, %c0_16] : memref<8x32xf32, #tpu.memory_space<vmem>>, vector<8x32xf32>
    tpu.vector_store %arg5[%c0_15, %c0_16], %28 {strides = array<i32>} : memref<8x32xf32, #tpu.memory_space<vmem>>, vector<8x32xf32>,
    return
  }
  func.func @transform_0(%arg0: i32) -> (i32, i32) {
    %c0_i32 = arith.constant 0 : i32
    %c0_i32_0 = arith.constant 0 : i32
    return %arg0, %c0_i32 : i32, i32
  }
  func.func @transform_1(%arg0: i32) -> (i32, i32) {
    %c0_i32 = arith.constant 0 : i32
    %c0_i32_0 = arith.constant 0 : i32
    return %arg0, %c0_i32 : i32, i32
  }
  func.func @transform_2(%arg0: i32) -> (i32, i32) {
    %c0_i32 = arith.constant 0 : i32
    %c0_i32_0 = arith.constant 0 : i32
    %c0_i32_1 = arith.constant 0 : i32
    return %c0_i32, %c0_i32_0 : i32, i32
  }
  func.func @transform_3(%arg0: i32) -> (i32, i32) {
    %c0_i32 = arith.constant 0 : i32
    %c0_i32_0 = arith.constant 0 : i32
    %c0_i32_1 = arith.constant 0 : i32
    return %c0_i32, %c0_i32_0 : i32, i32
  }
  func.func @transform_4(%arg0: i32) -> (i32, i32) {
    %c0_i32 = arith.constant 0 : i32
    %c0_i32_0 = arith.constant 0 : i32
    return %arg0, %c0_i32 : i32, i32
  }
  func.func @transform_5(%arg0: i32) -> (i32, i32) {
    %c0_i32 = arith.constant 0 : i32
    %c0_i32_0 = arith.constant 0 : i32
    return %arg0, %c0_i32 : i32, i32
  }
}

</mosaic_0001>

<bundles_post_ra>
// kernel: tpu_custom_call.1
= control target key start
LH: loop header
LB: loop body
LE: loop exit
PB: predicated region body
PF: predicated region fallthrough
CT: control target
= control target key end

     0   :  { %s1057_s0 = inlined_call_operand.hbm [shape: f32[16,32], index: 0, kind: input, shape index: {}]   ;;  %s1058_s1 = inlined_call_operand.hbm [shape: f32[16,32], index: 1, kind: input, shape index: {}]   ;;  %s1059_s2 = inlined_call_operand.hbm [shape: f32[32,32], index: 2, kind: input, shape index: {}]   ;;  %s1060_s3 = inlined_call_operand.vmem [shape: f32[1,32], index: 3, kind: input, shape index: {}]   ;;  %s1061_s4 = inlined_call_operand.hbm [shape: f32[16,32], index: 4, kind: output, shape index: {0}]   ;;  %s1062_s5 = inlined_call_operand.hbm [shape: f32[16,32], index: 5, kind: output, shape index: {1}]  }
   0x1   :  { %1066 = sst [smem:[#allocation19_spill]] %s1059_s2 }
   0x2   :  { %11 = vsyncpa [#allocation3], 0 }
   0x3   :  { %13 = vsyncpa [#allocation3 + $0x1], 0 }
   0x4   :  { %14 = vsyncpa [#allocation6], 0 }
   0x5   :  { %16 = vsyncpa [#allocation6 + $0x1], 0 }
   0x6   :  { %17 = vsyncpa [#allocation4], 0 }
   0x7   :  { %19 = vsyncpa [#allocation4 + $0x1], 0 }
   0x8   :  { %20 = vsyncpa [#allocation10], 0 }
   0x9   :  { %22 = vsyncpa [#allocation10 + $0x1], 0  ;;  %s864_s18 = smov 0   ;;  %s866_s19 = smov 0  }
   0xa   :  { %s868_s20 = smov 0   ;;  %s870_s21 = smov 0  }
   0xb LB: > { %1067 = sst [smem:[#allocation16_spill]] %s825_s20  ;;  %s888_s25 = sadd.s32 4294967295, %s829_s21   ;;  %s829_s21 = sphi %s870_s21, %s1078_s21   ;;  %s825_s20 = sphi %s868_s20, %s1080_s20   ;;  %s821_s19 = sphi %s866_s19, %s1082_s19   ;;  %s817_s18 = sphi %s864_s18, %s1081_s18  }
   0xc   : > { %s1068_s2 = sld [smem:[#allocation19_spill]]  ;;  %p541_p0 = scmp.ge.s32.totalorder %s829_s21, 1 }
   0xd   : > { %p49_p1 = scmp.eq.s32.totalorder %s888_s25, 0  ;;  %p179_p2 = scmp.lt.s32.totalorder %s829_s21, 3 }
   0xe   : > { %s831_s27 = smov [#allocation7]   ;;  %s832_s29 = smov 128  }
   0xf   : > { %p893_p3 = pnand %p541_p0, %p179_p2  ;;  %s192_s28 = sshll.u32 %s831_s27, 4  ;;  %s193_s28 = int_to_ptr.vmem [resolvable:$true] %s192_s28 }
  0x10   : > { %s833_s30 = smov 8   ;;  %s540_s6 = sadd.s32 4294967294, %s829_s21  }
  0x11   : > { %p573_p4 = pneg %p893_p3  ;;  %s904_s7 = sadd.s32 1, %s829_s21  }
  0x12   : > { %s190_s24 = sshll.u32 %s1068_s2, 4  ;;  %1070 = sst [smem:[#allocation17_spill]] %s904_s7  ;;  %s191_s24 = int_to_ptr.hbm [resolvable:$true] %s190_s24 }
  0x13   : > { %p574_p6 = pnand %p573_p4, %p49_p1  ;;  %s35_s8 = sadd.s32 1, %s825_s20 }
  0x14   : > { %s32_s9 = ssub.s32 %s829_s21, %s904_s7  ;;  %p42_p7 = scmp.ne.s32.totalorder %s825_s20, %s821_s19 }
  0x15   : > { %576 = dma.hbm_to_vmem [thread:$0]  (!%p574_p6), %s191_s24, 512, %s193_s28, [#allocation6], %s832_s29, %s832_s29, %s833_s30  }
  0x16   : > { %p33_p8 = scmp.eq.s32.totalorder %s32_s9, 0  ;;  %p43_p9 = scmp.eq.s32.totalorder %s829_s21, 0 }
  0x17   : > { %p48_p10 = scmp.ne.s32.totalorder %s821_s19, %s817_s18  ;;  %p140_p11 = scmp.eq.s32.totalorder %s888_s25, 1 }
  0x18   : > { %s916_s10 = scalar_select %p33_p8, %s825_s20, %s35_s8  }
  0x19   : > { %p918_p12 = por %p43_p9, %p42_p7  ;;  %p924_p13 = por %p49_p1, %p48_p10 }
  0x1a   : > { %1071 = sst [smem:[#allocation18_spill]] %s916_s10  ;;  %p928_p0 = por %p140_p11, %p42_p7 }
  0x1b   : > { %p146_p2 = scmp.eq.s32.totalorder %s540_s6, 1  ;;  %p592_p4 = scmp.lt.s32.totalorder %s829_s21, 2 }
  0x1c   : > { %s209_s14 = sand.u32 1, %s825_s20   ;;  %s545_s17 = sshll.u32 %s829_s21, 3 }
  0x1d   : > { %p934_p6 = por %p146_p2, %p48_p10  ;;  %s544_s16 = sshll.u32 %s209_s14, 3 }
  0x1e   : > { %s217_s24 = scalar_lea.hbm %s1057_s0, %s545_s17  ;;  %s213_s28 = scalar_lea.vmem [#allocation2], %s544_s16 }
  0x1f   : > { %s219_s27 = sshll.u32 %s217_s24, 4  ;;  %s221_s29 = sshll.u32 %s213_s28, 4  ;;  %s220_s27 = int_to_ptr.hbm [resolvable:$true] %s219_s27  ;;  %s222_s29 = int_to_ptr.vmem [resolvable:$true] %s221_s29 }
  0x20   : > { %p944_p7 = pnand %p592_p4, %p918_p12  ;;  %s236_s9 = scalar_lea.hbm %s1058_s1, %s545_s17 }
  0x21   : > { %s228_s2 = sand.u32 1, %s829_s21   ;;  %s210_s10 = scalar_lea.sflag [#allocation3], %s209_s14 }
  0x22   : > { %s663_s22 = sshra.s32 %s220_s27, 4  ;;  %p667_p9 = pneg %p944_p7  ;;  %s664_s22 = int_to_ptr.hbm [resolvable:$true] %s663_s22 }
  0x23   : > { %s665_s23 = scalar_lea.hbm %s664_s22, 8  ;;  %s670_s28 = scalar_lea.hbm %s1057_s0, 16 }
  0x24   : > { %p666_p8 = scmp.ne.s32.totalorder %s664_s22, %s665_s23  ;;  %p671_p12 = scmp.lt.s32.totalorder %s664_s22, %s1057_s0 }
  0x25   : > { %p672_p2 = scmp.lt.s32.totalorder %s670_s28, %s665_s23 }
  0x26   : > { %p668_p10 = pnand %p667_p9, %p666_p8 }
  0x27   : > { %p673_p4 = por %p672_p2, %p671_p12 }
  0x28   : > { %p669_p11 = pneg %p668_p10 }
  0x2a   : > { %p674_p5 = pnand %p673_p4, %p669_p11 }
  0x2c   : > { %677 = shalt.err (!%p674_p5)
}
  0x2d   : > { %580 = dma.hbm_to_vmem [thread:$0]  (!%p944_p7), %s220_s27, 128, %s222_s29, %s210_s10  }
  0x2e   : > { %s238_s14 = sshll.u32 %s236_s9, 4  ;;  %s232_s17 = scalar_lea.vmem [#allocation5], %s544_s16  ;;  %s239_s14 = int_to_ptr.hbm [resolvable:$true] %s238_s14 }
  0x2f   : > { %s240_s20 = sshll.u32 %s232_s17, 4  ;;  %s229_s7 = scalar_lea.sflag [#allocation6], %s228_s2  ;;  %s241_s20 = int_to_ptr.vmem [resolvable:$true] %s240_s20 }
  0x30   : > { %s693_s11 = sshra.s32 %s239_s14, 4  ;;  %s700_s28 = scalar_lea.hbm %s1058_s1, 16  ;;  %s694_s11 = int_to_ptr.hbm [resolvable:$true] %s693_s11 }
  0x31   : > { %s695_s24 = scalar_lea.hbm %s694_s11, 8  ;;  %p701_p5 = scmp.lt.s32.totalorder %s694_s11, %s1058_s1 }
  0x32   : > { %p696_p8 = scmp.ne.s32.totalorder %s694_s11, %s695_s24  ;;  %p702_p11 = scmp.lt.s32.totalorder %s700_s28, %s695_s24 }
  0x34   : > { %p698_p10 = pnand %p696_p8, %p667_p9  ;;  %p703_p2 = por %p702_p11, %p701_p5 }
  0x36   : > { %p699_p12 = pneg %p698_p10 }
  0x38   : > { %p704_p4 = pnand %p703_p2, %p699_p12 }
  0x3a   : > { %707 = shalt.err (!%p704_p4)
}
  0x3b   : > { %583 = dma.hbm_to_vmem [thread:$0]  (!%p944_p7), %s239_s14, 128, %s241_s20, %s229_s7  }
  0x3c   : > { %249 = sbr.rel (%p893_p3) target bundleno = 358 (0x166), region = 36  ;;  %s979_s2 = sand.u32 (!%p893_p3), 1, %s821_s19  }
  0x3d   : > { %s982_s16 = sshll.u32 (!%p893_p3), %s979_s2, 3  ;;  %s252_s27 = scalar_lea.sflag (!%p893_p3), [#allocation3], %s979_s2 }
  0x3e   : > { %s255_s29 = scalar_lea.vmem (!%p893_p3), [#allocation2], %s982_s16 }
  0x41   : > { %796 = dma.done.wait (%p924_p13), %s252_s27, 128  }
  0x42   : > { %798 = vsyncadd (%p924_p13), %s252_s27, 4294967168  ;;  %s261_s20 = sand.u32 1, %s888_s25   ;;  %s265_s7 = scalar_lea.vmem [#allocation5], %s982_s16 }
  0x43   : > { %s262_s26 = scalar_lea.sflag [#allocation6], %s261_s20 }
  0x44   : > { %800 = dma.done.wait (%p924_p13), %s262_s26, 128  }
  0x45   : > { %802 = vsyncadd (%p924_p13), %s262_s26, 4294967168 }
  0x46   : > { %804 = dma.done.wait (%p49_p1), [#allocation6], 512  }
  0x47   : > { %806 = vsyncadd (%p49_p1), [#allocation6], 4294966784  ;;  %v308_v0 = vld [vmem:[%s265_s7] sm:$0xff]  ;;  %v309_v1 = vld [vmem:[%s255_s29] sm:$0xff]  ;;  %vm311_vm0 = vcmask 261120   ;;  %s557_s12 = sshll.u32 %s888_s25, 3 }
  0x48   : > { %v310_v2 = vadd.f32 %v309_v1, %v308_v0  ;;  %v341_v6 = vld [vmem:[#allocation7 + $0x18] sm:$0xff]  ;;  %v340_v7 = vld [vmem:[#allocation7 + $0x10] sm:$0xff]  ;;  %v339_v8 = vld [vmem:[#allocation7 + $0x8] sm:$0xff]  ;;  %s307_s30 = scalar_lea.vmem [#allocation9], %s982_s16  ;;  %s400_s14 = scalar_lea.hbm %s1062_s5, %s557_s12 }
  0x49   : > { %361 = vmatpush.msra.mxu0 %v341_v6  ;;  %v338_v10 = vld [vmem:[#allocation7] sm:$0xff]  ;;  %s402_s17 = sshll.u32 %s307_s30, 4  ;;  %s404_s11 = sshll.u32 %s400_s14, 4  ;;  %s403_s17 = int_to_ptr.vmem [resolvable:$true] %s402_s17  ;;  %s405_s11 = int_to_ptr.hbm [resolvable:$true] %s404_s11 }
  0x4a   : > { %v313_v3 = vsel %vm311_vm0, %v310_v2, 0.0  ;;  %v316_v4 = vmul.f32 %v310_v2, %v310_v2  ;;  %312 = vst.msk [vmem:[%s307_s30] sm:$0xff] %vm311_vm0, %v310_v2  ;;  %s376_s24 = scalar_lea.sflag [#allocation10], %s979_s2  ;;  %s737_s22 = sshra.s32 %s405_s11, 4  ;;  %s738_s22 = int_to_ptr.hbm [resolvable:$true] %s737_s22 }
  0x4b   : > { %314 = vadd.xlane.f32.xlu0 %v313_v3  ;;  %362 = vmatpush.msra.mxu0 %v340_v7  ;;  %s739_s23 = scalar_lea.hbm %s738_s22, 8  ;;  %s743_s6 = scalar_lea.hbm %s1062_s5, 16 }
  0x4c   : > { %v317_v5 = vsel %vm311_vm0, %v316_v4, 0.0  ;;  %p740_p1 = scmp.ne.s32.totalorder %s738_s22, %s739_s23  ;;  %p744_p7 = scmp.lt.s32.totalorder %s738_s22, %s1062_s5 }
  0x4d   : > { %363 = vmatpush.msra.mxu0 %v339_v8  ;;  %p745_p9 = scmp.lt.s32.totalorder %s743_s6, %s739_s23 }
  0x4e   : > { %p741_p3 = pnand %p740_p1, %p928_p0 }
  0x4f   : > { %364 = vmatpush.msra.mxu0 %v338_v10  ;;  %p746_p8 = por %p745_p9, %p744_p7 }
  0x50   : > { %p742_p13 = pneg %p741_p3 }
  0x52   : > { %p747_p10 = pnand %p746_p8, %p742_p13 }
  0x53   : > { %318 = vadd.xlane.f32.xlu0 %v317_v5 }
  0xbe   : > { %v315_v9 = vpop.xlane.xlu0 %314 }
  0xbf   : > { %v320_v11 = vmul.f32 0.03125, %v315_v9 }
  0xc1   : > { %v322_v13 = vmul.f32 %v320_v11, %v320_v11  ;;  %v325_v24 = vsub.f32 %v310_v2, %v320_v11 }
  0xc6   : > { %v319_v12 = vpop.xlane.xlu0 %318 }
  0xc7   : > { %v321_v14 = vmul.f32 0.03125, %v319_v12 }
  0xc9   : > { %v323_v15 = vsub.f32 %v321_v14, %v322_v13 }
  0xcb   : > { %v324_v16 = vmax.f32 %v323_v15, 0.0 }
  0xcd   : > { %v326_v17 = vadd.f32 1e-05, %v324_v16 }
  0xcf   : > { %631 = vrsqrt.f32 %v326_v17  ;;  %vm333_vm2 = vweird.f32 %v326_v17 }
  0xd5   : > { %v632_v18 = vpop.eup %631 }
  0xd6   : > { %v328_v19 = vmul.f32 %v632_v18, %v326_v17  ;;  %vm334_vm1 = vweird.f32 %v632_v18 }
  0xd7   : > { %vm335_vm3 = vmor %vm333_vm2, %vm334_vm1 }
  0xd8   : > { %v329_v20 = vmul.f32 %v632_v18, %v328_v19 }
  0xda   : > { %v330_v21 = vmul.f32 0.5, %v329_v20 }
  0xdc   : > { %v331_v22 = vsub.f32 1.5, %v330_v21 }
  0xde   : > { %v332_v23 = vmul.f32 %v632_v18, %v331_v22 }
  0xe0   : > { %v336_v25 = vsel %vm335_vm3, %v632_v18, %v332_v23 }
  0xe1   : > { %v337_v26 = vmul.f32 %v336_v25, %v325_v24 }
  0xe3   : > { %554 = vmatmul.msk.f32.vlgmr.msra.gmra.mxu0 %vm311_vm0, %v337_v26 }
  0xe4   : > { %750 = shalt.err (!%p747_p10)
}
  0xe5   : > { %570 = dma.vmem_to_hbm [thread:$0]  (%p928_p0), %s403_s17, 128, %s405_s11, %s376_s24   ;;  %v630_v27 = vld [vmem:[%s1060_s3] ss:$0 sm:$0xff] }
  0xe6   : > { %s386_s26 = scalar_lea.hbm %s1061_s4, %s557_s12  ;;  %s300_s9 = scalar_lea.vmem [#allocation8], %s982_s16 }
  0xe7   : > { %s388_s8 = sshll.u32 %s300_s9, 4  ;;  %s390_s14 = sshll.u32 %s386_s26, 4  ;;  %s389_s8 = int_to_ptr.vmem [resolvable:$true] %s388_s8  ;;  %s391_s14 = int_to_ptr.hbm [resolvable:$true] %s390_s14 }
  0xe8   : > { %s371_s22 = scalar_lea.sflag [#allocation4], %s979_s2  ;;  %s765_s17 = sshra.s32 %s391_s14, 4  ;;  %s766_s17 = int_to_ptr.hbm [resolvable:$true] %s765_s17 }
  0xe9   : > { %s767_s11 = scalar_lea.hbm %s766_s17, 8  ;;  %s771_s16 = scalar_lea.hbm %s1061_s4, 16 }
  0xea   : > { %p768_p12 = scmp.ne.s32.totalorder %s766_s17, %s767_s11  ;;  %p772_p2 = scmp.lt.s32.totalorder %s766_s17, %s1061_s4 }
  0xeb   : > { %p773_p4 = scmp.lt.s32.totalorder %s771_s16, %s767_s11 }
  0xec   : > { %p769_p5 = pnand %p768_p12, %p928_p0 }
  0xed   : > { %p774_p1 = por %p773_p4, %p772_p2 }
  0xee   : > { %p770_p11 = pneg %p769_p5 }
  0xf0   : > { %p775_p3 = pnand %p774_p1, %p770_p11 }
 0x160   : > { %v366_v28 = vpop.f32.mrf.mxu0 }
 0x161   : > { %v367_v29 = vadd.f32 %v630_v27, %v366_v28 }
 0x163   : > { %369 = vst.msk [vmem:[%s300_s9] sm:$0xff] %vm311_vm0, %v367_v29 }
 0x164   : > { %778 = shalt.err (!%p775_p3)
}
 0x165   : > { %569 = dma.vmem_to_hbm [thread:$0]  (%p928_p0), %s389_s8, 128, %s391_s14, %s371_s22  }
 0x166 PF: > { %s416_s2 = sand.u32 1, %s817_s18   ;;  %p1077_p13 = scmp.ge.s32.totalorder %s829_s21, 2 }
 0x167   : > { %s417_s28 = scalar_lea.sflag [#allocation4], %s416_s2 }
 0x168   : > { %p585_p7 = pnand %p1077_p13, %p934_p6 }
 0x16a   : > { %p586_p9 = pneg %p585_p7 }
 0x16c   : > { %808 = dma.done.wait (%p586_p9), %s417_s28, 128  }
 0x16d   : > { %810 = vsyncadd (%p586_p9), %s417_s28, 4294967168  ;;  %s427_s6 = scalar_lea.sflag [#allocation10], %s416_s2 }
 0x16e   : > { %812 = dma.done.wait (%p586_p9), %s427_s6, 128  }
 0x16f   : > { %814 = vsyncadd (%p586_p9), %s427_s6, 4294967168  ;;  %s1078_s21 = sld [smem:[#allocation17_spill]]  ;;  %s1081_s18 = smov %s821_s19 }
 0x170   : > { %s1079_s10 = sld [smem:[#allocation16_spill]] }
 0x171   : > { %s1080_s20 = sld [smem:[#allocation18_spill]] }
 0x175   : > { %p25_p0 = scmp.ge.s32.totalorder %s1078_s21, 4  }
 0x176   : > { %s1082_s19 = smov %s1079_s10 }
 0x177   :  { %27 = sbr.rel (!%p25_p0) target bundleno = 11 (0xb), region = 115 }
 0x17c   :  { %433 = vsyncpa [#allocation3], 1 }
 0x17d   :  { %435 = vsyncpa [#allocation3 + $0x1], 1 }
 0x17e   :  { %436 = vsyncpa [#allocation6], 1 }
 0x17f   :  { %438 = vsyncpa [#allocation6 + $0x1], 1 }
 0x180   :  { %439 = vsyncpa [#allocation4], 1 }
 0x181   :  { %441 = vsyncpa [#allocation4 + $0x1], 1 }
 0x182   :  { %442 = vsyncpa [#allocation10], 1 }
 0x183   :  { %444 = vsyncpa [#allocation10 + $0x1], 1 }

// kernel: tpu_custom_call.1
= control target key start
LH: loop header
LB: loop body
LE: loop exit
PB: predicated region body
PF: predicated region fallthrough
CT: control target
= control target key end

     0   :  { %s1057_s0 = inlined_call_operand.hbm [shape: f32[16,32], index: 0, kind: input, shape index: {}]   ;;  %s1058_s1 = inlined_call_operand.hbm [shape: f32[16,32], index: 1, kind: input, shape index: {}]   ;;  %s1059_s2 = inlined_call_operand.hbm [shape: f32[32,32], index: 2, kind: input, shape index: {}]   ;;  %s1060_s3 = inlined_call_operand.vmem [shape: f32[1,32], index: 3, kind: input, shape index: {}]   ;;  %s1061_s4 = inlined_call_operand.hbm [shape: f32[16,32], index: 4, kind: output, shape index: {0}]   ;;  %s1062_s5 = inlined_call_operand.hbm [shape: f32[16,32], index: 5, kind: output, shape index: {1}]  }
   0x1   :  { %1066 = sst [smem:[#allocation19_spill]] %s1059_s2 }
   0x2   :  { %11 = vsyncpa [#allocation3], 0 }
   0x3   :  { %13 = vsyncpa [#allocation3 + $0x1], 0 }
   0x4   :  { %14 = vsyncpa [#allocation6], 0 }
   0x5   :  { %16 = vsyncpa [#allocation6 + $0x1], 0 }
   0x6   :  { %17 = vsyncpa [#allocation4], 0 }
   0x7   :  { %19 = vsyncpa [#allocation4 + $0x1], 0 }
   0x8   :  { %20 = vsyncpa [#allocation10], 0 }
   0x9   :  { %22 = vsyncpa [#allocation10 + $0x1], 0  ;;  %s864_s18 = smov 0   ;;  %s866_s19 = smov 0  }
   0xa   :  { %s868_s20 = smov 0   ;;  %s870_s21 = smov 0  }
   0xb LB: > { %1067 = sst [smem:[#allocation16_spill]] %s825_s20  ;;  %s888_s25 = sadd.s32 4294967295, %s829_s21   ;;  %s829_s21 = sphi %s870_s21, %s1078_s21   ;;  %s825_s20 = sphi %s868_s20, %s1080_s20   ;;  %s821_s19 = sphi %s866_s19, %s1082_s19   ;;  %s817_s18 = sphi %s864_s18, %s1081_s18  }
   0xc   : > { %s1068_s2 = sld [smem:[#allocation19_spill]]  ;;  %p541_p0 = scmp.ge.s32.totalorder %s829_s21, 1 }
   0xd   : > { %p49_p1 = scmp.eq.s32.totalorder %s888_s25, 0  ;;  %p179_p2 = scmp.lt.s32.totalorder %s829_s21, 3 }
   0xe   : > { %s831_s27 = smov [#allocation7]   ;;  %s832_s29 = smov 128  }
   0xf   : > { %p893_p3 = pnand %p541_p0, %p179_p2  ;;  %s192_s28 = sshll.u32 %s831_s27, 4  ;;  %s193_s28 = int_to_ptr.vmem [resolvable:$true] %s192_s28 }
  0x10   : > { %s833_s30 = smov 8   ;;  %s540_s6 = sadd.s32 4294967294, %s829_s21  }
  0x11   : > { %p573_p4 = pneg %p893_p3  ;;  %s904_s7 = sadd.s32 1, %s829_s21  }
  0x12   : > { %s190_s24 = sshll.u32 %s1068_s2, 4  ;;  %1070 = sst [smem:[#allocation17_spill]] %s904_s7  ;;  %s191_s24 = int_to_ptr.hbm [resolvable:$true] %s190_s24 }
  0x13   : > { %p574_p6 = pnand %p573_p4, %p49_p1  ;;  %s35_s8 = sadd.s32 1, %s825_s20 }
  0x14   : > { %s32_s9 = ssub.s32 %s829_s21, %s904_s7  ;;  %p42_p7 = scmp.ne.s32.totalorder %s825_s20, %s821_s19 }
  0x15   : > { %576 = dma.hbm_to_vmem [thread:$0]  (!%p574_p6), %s191_s24, 512, %s193_s28, [#allocation6], %s832_s29, %s832_s29, %s833_s30  }
  0x16   : > { %p33_p8 = scmp.eq.s32.totalorder %s32_s9, 0  ;;  %p43_p9 = scmp.eq.s32.totalorder %s829_s21, 0 }
  0x17   : > { %p48_p10 = scmp.ne.s32.totalorder %s821_s19, %s817_s18  ;;  %p140_p11 = scmp.eq.s32.totalorder %s888_s25, 1 }
  0x18   : > { %s916_s10 = scalar_select %p33_p8, %s825_s20, %s35_s8  }
  0x19   : > { %p918_p12 = por %p43_p9, %p42_p7  ;;  %p924_p13 = por %p49_p1, %p48_p10 }
  0x1a   : > { %1071 = sst [smem:[#allocation18_spill]] %s916_s10  ;;  %p928_p0 = por %p140_p11, %p42_p7 }
  0x1b   : > { %p146_p2 = scmp.eq.s32.totalorder %s540_s6, 1  ;;  %p592_p4 = scmp.lt.s32.totalorder %s829_s21, 2 }
  0x1c   : > { %s209_s14 = sand.u32 1, %s825_s20   ;;  %s545_s17 = sshll.u32 %s829_s21, 3 }
  0x1d   : > { %p934_p6 = por %p146_p2, %p48_p10  ;;  %s544_s16 = sshll.u32 %s209_s14, 3 }
  0x1e   : > { %s217_s24 = scalar_lea.hbm %s1057_s0, %s545_s17  ;;  %s213_s28 = scalar_lea.vmem [#allocation2], %s544_s16 }
  0x1f   : > { %s219_s27 = sshll.u32 %s217_s24, 4  ;;  %s221_s29 = sshll.u32 %s213_s28, 4  ;;  %s220_s27 = int_to_ptr.hbm [resolvable:$true] %s219_s27  ;;  %s222_s29 = int_to_ptr.vmem [resolvable:$true] %s221_s29 }
  0x20   : > { %p944_p7 = pnand %p592_p4, %p918_p12  ;;  %s236_s9 = scalar_lea.hbm %s1058_s1, %s545_s17 }
  0x21   : > { %s228_s2 = sand.u32 1, %s829_s21   ;;  %s210_s10 = scalar_lea.sflag [#allocation3], %s209_s14 }
  0x22   : > { %s663_s22 = sshra.s32 %s220_s27, 4  ;;  %p667_p9 = pneg %p944_p7  ;;  %s664_s22 = int_to_ptr.hbm [resolvable:$true] %s663_s22 }
  0x23   : > { %s665_s23 = scalar_lea.hbm %s664_s22, 8  ;;  %s670_s28 = scalar_lea.hbm %s1057_s0, 16 }
  0x24   : > { %p666_p8 = scmp.ne.s32.totalorder %s664_s22, %s665_s23  ;;  %p671_p12 = scmp.lt.s32.totalorder %s664_s22, %s1057_s0 }
  0x25   : > { %p672_p2 = scmp.lt.s32.totalorder %s670_s28, %s665_s23 }
  0x26   : > { %p668_p10 = pnand %p667_p9, %p666_p8 }
  0x27   : > { %p673_p4 = por %p672_p2, %p671_p12 }
  0x28   : > { %p669_p11 = pneg %p668_p10 }
  0x2a   : > { %p674_p5 = pnand %p673_p4, %p669_p11 }
  0x2c   : > { %677 = shalt.err (!%p674_p5)
}
  0x2d   : > { %580 = dma.hbm_to_vmem [thread:$0]  (!%p944_p7), %s220_s27, 128, %s222_s29, %s210_s10  }
  0x2e   : > { %s238_s14 = sshll.u32 %s236_s9, 4  ;;  %s232_s17 = scalar_lea.vmem [#allocation5], %s544_s16  ;;  %s239_s14 = int_to_ptr.hbm [resolvable:$true] %s238_s14 }
  0x2f   : > { %s240_s20 = sshll.u32 %s232_s17, 4  ;;  %s229_s7 = scalar_lea.sflag [#allocation6], %s228_s2  ;;  %s241_s20 = int_to_ptr.vmem [resolvable:$true] %s240_s20 }
  0x30   : > { %s693_s11 = sshra.s32 %s239_s14, 4  ;;  %s700_s28 = scalar_lea.hbm %s1058_s1, 16  ;;  %s694_s11 = int_to_ptr.hbm [resolvable:$true] %s693_s11 }
  0x31   : > { %s695_s24 = scalar_lea.hbm %s694_s11, 8  ;;  %p701_p5 = scmp.lt.s32.totalorder %s694_s11, %s1058_s1 }
  0x32   : > { %p696_p8 = scmp.ne.s32.totalorder %s694_s11, %s695_s24  ;;  %p702_p11 = scmp.lt.s32.totalorder %s700_s28, %s695_s24 }
  0x34   : > { %p698_p10 = pnand %p696_p8, %p667_p9  ;;  %p703_p2 = por %p702_p11, %p701_p5 }
  0x36   : > { %p699_p12 = pneg %p698_p10 }
  0x38   : > { %p704_p4 = pnand %p703_p2, %p699_p12 }
  0x3a   : > { %707 = shalt.err (!%p704_p4)
}
  0x3b   : > { %583 = dma.hbm_to_vmem [thread:$0]  (!%p944_p7), %s239_s14, 128, %s241_s20, %s229_s7  }
  0x3c   : > { %249 = sbr.rel (%p893_p3) target bundleno = 358 (0x166), region = 36  ;;  %s979_s2 = sand.u32 (!%p893_p3), 1, %s821_s19  }
  0x3d   : > { %s982_s16 = sshll.u32 (!%p893_p3), %s979_s2, 3  ;;  %s252_s27 = scalar_lea.sflag (!%p893_p3), [#allocation3], %s979_s2 }
  0x3e   : > { %s255_s29 = scalar_lea.vmem (!%p893_p3), [#allocation2], %s982_s16 }
  0x41   : > { %796 = dma.done.wait (%p924_p13), %s252_s27, 128  }
  0x42   : > { %798 = vsyncadd (%p924_p13), %s252_s27, 4294967168  ;;  %s261_s20 = sand.u32 1, %s888_s25   ;;  %s265_s7 = scalar_lea.vmem [#allocation5], %s982_s16 }
  0x43   : > { %s262_s26 = scalar_lea.sflag [#allocation6], %s261_s20 }
  0x44   : > { %800 = dma.done.wait (%p924_p13), %s262_s26, 128  }
  0x45   : > { %802 = vsyncadd (%p924_p13), %s262_s26, 4294967168 }
  0x46   : > { %804 = dma.done.wait (%p49_p1), [#allocation6], 512  }
  0x47   : > { %806 = vsyncadd (%p49_p1), [#allocation6], 4294966784  ;;  %v308_v0 = vld [vmem:[%s265_s7] sm:$0xff]  ;;  %v309_v1 = vld [vmem:[%s255_s29] sm:$0xff]  ;;  %vm311_vm0 = vcmask 261120   ;;  %s557_s12 = sshll.u32 %s888_s25, 3 }
  0x48   : > { %v310_v2 = vadd.f32 %v309_v1, %v308_v0  ;;  %v341_v6 = vld [vmem:[#allocation7 + $0x18] sm:$0xff]  ;;  %v340_v7 = vld [vmem:[#allocation7 + $0x10] sm:$0xff]  ;;  %v339_v8 = vld [vmem:[#allocation7 + $0x8] sm:$0xff]  ;;  %s307_s30 = scalar_lea.vmem [#allocation9], %s982_s16  ;;  %s400_s14 = scalar_lea.hbm %s1062_s5, %s557_s12 }
  0x49   : > { %361 = vmatpush.msra.mxu0 %v341_v6  ;;  %v338_v10 = vld [vmem:[#allocation7] sm:$0xff]  ;;  %s402_s17 = sshll.u32 %s307_s30, 4  ;;  %s404_s11 = sshll.u32 %s400_s14, 4  ;;  %s403_s17 = int_to_ptr.vmem [resolvable:$true] %s402_s17  ;;  %s405_s11 = int_to_ptr.hbm [resolvable:$true] %s404_s11 }
  0x4a   : > { %v313_v3 = vsel %vm311_vm0, %v310_v2, 0.0  ;;  %v316_v4 = vmul.f32 %v310_v2, %v310_v2  ;;  %312 = vst.msk [vmem:[%s307_s30] sm:$0xff] %vm311_vm0, %v310_v2  ;;  %s376_s24 = scalar_lea.sflag [#allocation10], %s979_s2  ;;  %s737_s22 = sshra.s32 %s405_s11, 4  ;;  %s738_s22 = int_to_ptr.hbm [resolvable:$true] %s737_s22 }
  0x4b   : > { %314 = vadd.xlane.f32.xlu0 %v313_v3  ;;  %362 = vmatpush.msra.mxu0 %v340_v7  ;;  %s739_s23 = scalar_lea.hbm %s738_s22, 8  ;;  %s743_s6 = scalar_lea.hbm %s1062_s5, 16 }
  0x4c   : > { %v317_v5 = vsel %vm311_vm0, %v316_v4, 0.0  ;;  %p740_p1 = scmp.ne.s32.totalorder %s738_s22, %s739_s23  ;;  %p744_p7 = scmp.lt.s32.totalorder %s738_s22, %s1062_s5 }
  0x4d   : > { %363 = vmatpush.msra.mxu0 %v339_v8  ;;  %p745_p9 = scmp.lt.s32.totalorder %s743_s6, %s739_s23 }
  0x4e   : > { %p741_p3 = pnand %p740_p1, %p928_p0 }
  0x4f   : > { %364 = vmatpush.msra.mxu0 %v338_v10  ;;  %p746_p8 = por %p745_p9, %p744_p7 }
  0x50   : > { %p742_p13 = pneg %p741_p3 }
  0x52   : > { %p747_p10 = pnand %p746_p8, %p742_p13 }
  0x53   : > { %318 = vadd.xlane.f32.xlu0 %v317_v5 }
  0xbe   : > { %v315_v9 = vpop.xlane.xlu0 %314 }
  0xbf   : > { %v320_v11 = vmul.f32 0.03125, %v315_v9 }
  0xc1   : > { %v322_v13 = vmul.f32 %v320_v11, %v320_v11  ;;  %v325_v24 = vsub.f32 %v310_v2, %v320_v11 }
  0xc6   : > { %v319_v12 = vpop.xlane.xlu0 %318 }
  0xc7   : > { %v321_v14 = vmul.f32 0.03125, %v319_v12 }
  0xc9   : > { %v323_v15 = vsub.f32 %v321_v14, %v322_v13 }
  0xcb   : > { %v324_v16 = vmax.f32 %v323_v15, 0.0 }
  0xcd   : > { %v326_v17 = vadd.f32 1e-05, %v324_v16 }
  0xcf   : > { %631 = vrsqrt.f32 %v326_v17  ;;  %vm333_vm2 = vweird.f32 %v326_v17 }
  0xd5   : > { %v632_v18 = vpop.eup %631 }
  0xd6   : > { %v328_v19 = vmul.f32 %v632_v18, %v326_v17  ;;  %vm334_vm1 = vweird.f32 %v632_v18 }
  0xd7   : > { %vm335_vm3 = vmor %vm333_vm2, %vm334_vm1 }
  0xd8   : > { %v329_v20 = vmul.f32 %v632_v18, %v328_v19 }
  0xda   : > { %v330_v21 = vmul.f32 0.5, %v329_v20 }
  0xdc   : > { %v331_v22 = vsub.f32 1.5, %v330_v21 }
  0xde   : > { %v332_v23 = vmul.f32 %v632_v18, %v331_v22 }
  0xe0   : > { %v336_v25 = vsel %vm335_vm3, %v632_v18, %v332_v23 }
  0xe1   : > { %v337_v26 = vmul.f32 %v336_v25, %v325_v24 }
  0xe3   : > { %554 = vmatmul.msk.f32.vlgmr.msra.gmra.mxu0 %vm311_vm0, %v337_v26 }
  0xe4   : > { %750 = shalt.err (!%p747_p10)
}
  0xe5   : > { %570 = dma.vmem_to_hbm [thread:$0]  (%p928_p0), %s403_s17, 128, %s405_s11, %s376_s24   ;;  %v630_v27 = vld [vmem:[%s1060_s3] ss:$0 sm:$0xff] }
  0xe6   : > { %s386_s26 = scalar_lea.hbm %s1061_s4, %s557_s12  ;;  %s300_s9 = scalar_lea.vmem [#allocation8], %s982_s16 }
  0xe7   : > { %s388_s8 = sshll.u32 %s300_s9, 4  ;;  %s390_s14 = sshll.u32 %s386_s26, 4  ;;  %s389_s8 = int_to_ptr.vmem [resolvable:$true] %s388_s8  ;;  %s391_s14 = int_to_ptr.hbm [resolvable:$true] %s390_s14 }
  0xe8   : > { %s371_s22 = scalar_lea.sflag [#allocation4], %s979_s2  ;;  %s765_s17 = sshra.s32 %s391_s14, 4  ;;  %s766_s17 = int_to_ptr.hbm [resolvable:$true] %s765_s17 }
  0xe9   : > { %s767_s11 = scalar_lea.hbm %s766_s17, 8  ;;  %s771_s16 = scalar_lea.hbm %s1061_s4, 16 }
  0xea   : > { %p768_p12 = scmp.ne.s32.totalorder %s766_s17, %s767_s11  ;;  %p772_p2 = scmp.lt.s32.totalorder %s766_s17, %s1061_s4 }
  0xeb   : > { %p773_p4 = scmp.lt.s32.totalorder %s771_s16, %s767_s11 }
  0xec   : > { %p769_p5 = pnand %p768_p12, %p928_p0 }
  0xed   : > { %p774_p1 = por %p773_p4, %p772_p2 }
  0xee   : > { %p770_p11 = pneg %p769_p5 }
  0xf0   : > { %p775_p3 = pnand %p774_p1, %p770_p11 }
 0x160   : > { %v366_v28 = vpop.f32.mrf.mxu0 }
 0x161   : > { %v367_v29 = vadd.f32 %v630_v27, %v366_v28 }
 0x163   : > { %369 = vst.msk [vmem:[%s300_s9] sm:$0xff] %vm311_vm0, %v367_v29 }
 0x164   : > { %778 = shalt.err (!%p775_p3)
}
 0x165   : > { %569 = dma.vmem_to_hbm [thread:$0]  (%p928_p0), %s389_s8, 128, %s391_s14, %s371_s22  }
 0x166 PF: > { %s416_s2 = sand.u32 1, %s817_s18   ;;  %p1077_p13 = scmp.ge.s32.totalorder %s829_s21, 2 }
 0x167   : > { %s417_s28 = scalar_lea.sflag [#allocation4], %s416_s2 }
 0x168   : > { %p585_p7 = pnand %p1077_p13, %p934_p6 }
 0x16a   : > { %p586_p9 = pneg %p585_p7 }
 0x16c   : > { %808 = dma.done.wait (%p586_p9), %s417_s28, 128  }
 0x16d   : > { %810 = vsyncadd (%p586_p9), %s417_s28, 4294967168  ;;  %s427_s6 = scalar_lea.sflag [#allocation10], %s416_s2 }
 0x16e   : > { %812 = dma.done.wait (%p586_p9), %s427_s6, 128  }
 0x16f   : > { %814 = vsyncadd (%p586_p9), %s427_s6, 4294967168  ;;  %s1078_s21 = sld [smem:[#allocation17_spill]]  ;;  %s1081_s18 = smov %s821_s19 }
 0x170   : > { %s1079_s10 = sld [smem:[#allocation16_spill]] }
 0x171   : > { %s1080_s20 = sld [smem:[#allocation18_spill]] }
 0x175   : > { %p25_p0 = scmp.ge.s32.totalorder %s1078_s21, 4  }
 0x176   : > { %s1082_s19 = smov %s1079_s10 }
 0x177   :  { %27 = sbr.rel (!%p25_p0) target bundleno = 11 (0xb), region = 115 }
 0x17c   :  { %433 = vsyncpa [#allocation3], 1 }
 0x17d   :  { %435 = vsyncpa [#allocation3 + $0x1], 1 }
 0x17e   :  { %436 = vsyncpa [#allocation6], 1 }
 0x17f   :  { %438 = vsyncpa [#allocation6 + $0x1], 1 }
 0x180   :  { %439 = vsyncpa [#allocation4], 1 }
 0x181   :  { %441 = vsyncpa [#allocation4 + $0x1], 1 }
 0x182   :  { %442 = vsyncpa [#allocation10], 1 }
 0x183   :  { %444 = vsyncpa [#allocation10 + $0x1], 1 }

</bundles_post_ra>
